<compile_context>
chip_gen: v6e
topology: v6e:2x2x1
jax: 0.10.0
libtpu: 0.0.40
codegen_flags: <defaults>
</compile_context>

<pallas_src>
import jax
import jax.numpy as jnp
from jax.experimental import pallas as pl
from jax.experimental.pallas import tpu as pltpu


def mixed_decoder_kernel(w_ref, b_ref, x_ref, o_ref):
    """Grid = (batch_blocks, spatial_tiles); both axes independent ("parallel").

    w_ref: (Cout, Cin)    averaged + transposed 1x1-conv weight (VMEM resident)
    b_ref: (Cout, 1)      averaged bias (f32, broadcast along lanes)
    x_ref: (Nb, Cin, tp)  spatial tile of Nb batch elements (NCHW layout)
    o_ref: (Nb, Cout, tp) output tile (lane dim = spatial)
    """
    nb = x_ref.shape[0]
    w = w_ref[...]
    b = b_ref[...]
    for i in range(nb):  # small static unroll (nb <= 8); each dot is independent
        y = jnp.dot(w, x_ref[i], preferred_element_type=jnp.float32)
        o_ref[i] = (y + b).astype(o_ref.dtype)


_NB_MAX = 8                              # cap the static per-step batch unroll
_STEP_BUDGET_BYTES = 8 * 1024 * 1024     # in+out bytes per grid step (x2 when double-buffered)
_VMEM_LIMIT_BYTES = 32 * 1024 * 1024     # explicit scoped VMEM (v5e default is only 16 MiB)


def _choose_tiling(N, Cin, Cout, HW, dtype_bytes, step_budget_bytes):
    """Pick (Nb, tp): batch elements per step and spatial tile width."""
    per_col = (Cin + Cout) * dtype_bytes
    cols = max(128, step_budget_bytes // per_col)   # columns of in+out per step
    if HW > cols:
        # Tile the spatial axis with a lane-aligned tile.  If HW % tp != 0 the
        # boundary tile is masked by Pallas (safe: per-column independent op,
        # and this kernel must never grow cross-lane/spatial reductions).
        tp = max(128, (cols // 128) * 128)
        return 1, tp
    # Whole image per step -> one contiguous (Cin, HW) DMA.  Pack several batch
    # elements per step to amortize the fixed per-grid-step overhead.
    nb = max(1, min(N, _NB_MAX, cols // HW))
    while N % nb != 0:          # exact batch blocks (no ragged batch tiles)
        nb -= 1
    if N >= 2 and N // nb < 2:  # v7x: keep >= 2 grid steps so both TCs get work
        nb = max(1, nb // 2)
        while N % nb != 0:
            nb -= 1
    return nb, HW


def mixed_decoder(x_nchw, weights, biases, *, step_budget_bytes=_STEP_BUDGET_BYTES):
    """x_nchw: (N, Cin, H, W); weights: (K, Cin, Cout); biases: (K, Cout)."""
    N, Cin, H, W = x_nchw.shape
    K, _, Cout = weights.shape
    HW = H * W

    # Fold the K-head mean into the (tiny) parameters once, in the wrapper:
    #   mean_k(x @ W_k + b_k) == x @ mean_k(W_k) + mean_k(b_k)
    w_t = jnp.mean(weights, axis=0).T.astype(x_nchw.dtype)          # (Cout, Cin)
    b_col = jnp.mean(biases, axis=0).reshape(Cout, 1).astype(jnp.float32)

    x_flat = x_nchw.reshape(N, Cin, HW)      # free contiguous reshape; NO pad

    dtype_bytes = jnp.dtype(x_nchw.dtype).itemsize
    nb, tp = _choose_tiling(N, Cin, Cout, HW, dtype_bytes, step_budget_bytes)
    grid = (N // nb, pl.cdiv(HW, tp))

    out = pl.pallas_call(
        mixed_decoder_kernel,
        out_shape=jax.ShapeDtypeStruct((N, Cout, HW), x_nchw.dtype),
        grid_spec=pltpu.PrefetchScalarGridSpec(
            num_scalar_prefetch=0,
            grid=grid,
            in_specs=[
                pl.BlockSpec((Cout, Cin), lambda n, s: (0, 0)),      # resident
                pl.BlockSpec((Cout, 1), lambda n, s: (0, 0)),        # resident
                pl.BlockSpec((nb, Cin, tp), lambda n, s: (n, 0, s)),
            ],
            out_specs=pl.BlockSpec((nb, Cout, tp), lambda n, s: (n, 0, s)),
        ),
        compiler_params=pltpu.CompilerParams(
            dimension_semantics=("parallel", "parallel"),
            vmem_limit_bytes=_VMEM_LIMIT_BYTES,
        ),
    )(w_t, b_col, x_flat)

    return out.reshape(N, Cout, H, W)


def reference_mixed_decoder(x_nchw, weights, biases):
    """Pure-JAX reference matching PyTorch semantics (per-head conv, then mean)."""
    outs = jnp.einsum("nchw,kcd->kndhw", x_nchw, weights)
    outs = outs + biases[:, None, :, None, None]
    return jnp.mean(outs, axis=0)


def _run_case(key, N, Cin, H, W, Cout, K, **kw):
    kx, kw_, kb = jax.random.split(key, 3)
    x = jax.random.normal(kx, (N, Cin, H, W), dtype=jnp.float32)
    weights = jax.random.normal(kw_, (K, Cin, Cout), dtype=jnp.float32) * (1.0 / Cin**0.5)
    biases = jax.random.normal(kb, (K, Cout), dtype=jnp.float32) * 0.1
    out = jax.block_until_ready(mixed_decoder(x, weights, biases, **kw))
    ref = reference_mixed_decoder(x, weights, biases)
    assert out.shape == (N, Cout, H, W)
    assert jnp.allclose(out, ref, atol=1e-5, rtol=1e-5)


if __name__ == "__main__":
    key = jax.random.PRNGKey(0)
    k0, k1, k2 = jax.random.split(key, 3)

    # Primary small case: batch=2, Cin=4, spatial=16x16, Cout=8, K=3 heads
    # (nb=1 per step so both v7x TensorCores get a batch element each).
    _run_case(k0, N=2, Cin=4, H=16, W=16, Cout=8, K=3)

    # Ragged spatial case with a tiny step budget to force tp=128 and exercise
    # the masked boundary tile (HW=300, grid spatial = 3, last tile partial).
    _run_case(k1, N=1, Cin=4, H=10, W=30, Cout=8, K=2, step_budget_bytes=6144)

    # Small-image case exercising nb>1 batch packing per grid step.
    _run_case(k2, N=4, Cin=4, H=8, W=8, Cout=8, K=3)

    print("KERNEL_OK")
</pallas_src>

<mosaic_0001>
module attributes {stable_mosaic.version = 11 : i64} {
  func.func @mixed_decoder_kernel(%arg0: i32, %arg1: i32, %arg2: memref<8x4xf32, #tpu.memory_space<vmem>>, %arg3: memref<8x1xf32, #tpu.memory_space<vmem>>, %arg4: memref<1x4x256xf32, #tpu.memory_space<vmem>>, %arg5: memref<1x8x256xf32, #tpu.memory_space<vmem>>) attributes {dimension_semantics = [#tpu.dimension_semantics<parallel>, #tpu.dimension_semantics<parallel>], iteration_bounds = array<i64: 2, 1>, scalar_prefetch = 0 : i64, scratch_operands = 0 : i64, tpu.core_type = #tpu.core_type<tc>, window_params = [{pipeline_mode = #tpu.pipeline_mode<synchronous>, transform_indices = @transform_0, window_bounds = array<i64: 8, 4>}, {pipeline_mode = #tpu.pipeline_mode<synchronous>, transform_indices = @transform_1, window_bounds = array<i64: 8, 1>}, {transform_indices = @transform_2, window_bounds = array<i64: 1, 4, 256>}, {transform_indices = @transform_3, window_bounds = array<i64: 1, 8, 256>}]} {
    %c0 = arith.constant 0 : index
    %c0_0 = arith.constant 0 : index
    %0 = vector.load %arg2[%c0, %c0_0] : memref<8x4xf32, #tpu.memory_space<vmem>>, vector<8x4xf32>
    %c0_1 = arith.constant 0 : index
    %c0_2 = arith.constant 0 : index
    %1 = vector.load %arg3[%c0_1, %c0_2] : memref<8x1xf32, #tpu.memory_space<vmem>>, vector<8x1xf32>
    %c0_3 = arith.constant 0 : index
    %c0_4 = arith.constant 0 : index
    %c0_5 = arith.constant 0 : index
    %2 = vector.load %arg4[%c0_3, %c0_4, %c0_5] : memref<1x4x256xf32, #tpu.memory_space<vmem>>, vector<1x4x256xf32>
    %3 = vector.shape_cast %2 : vector<1x4x256xf32> to vector<4x256xf32>
    %cst = arith.constant dense<0.000000e+00> : vector<8x256xf32>
    %4 = tpu.matmul %0, %3, %cst {dimension_numbers = #tpu.dot_dimension_numbers<[1], [0], [0], [1], [0, 0, 1, 1], [], []>} : vector<8x4xf32>, vector<4x256xf32>, vector<8x256xf32> -> vector<8x256xf32>
    %5 = vector.broadcast %1 : vector<8x1xf32> to vector<8x256xf32>
    %6 = arith.addf %4, %5 : vector<8x256xf32>
    %c0_6 = arith.constant 0 : index
    %c0_7 = arith.constant 0 : index
    %c0_8 = arith.constant 0 : index
    %7 = vector.load %arg5[%c0_6, %c0_7, %c0_8] : memref<1x8x256xf32, #tpu.memory_space<vmem>>, vector<1x8x256xf32>
    %8 = vector.shape_cast %7 : vector<1x8x256xf32> to vector<8x256xf32>
    %9 = vector.shape_cast %6 : vector<8x256xf32> to vector<1x8x256xf32>
    tpu.vector_store %arg5[%c0_6, %c0_7, %c0_8], %9 {strides = array<i32>} : memref<1x8x256xf32, #tpu.memory_space<vmem>>, vector<1x8x256xf32>,
    return
  }
  func.func @transform_0(%arg0: i32, %arg1: i32) -> (i32, i32) {
    %c0_i32 = arith.constant 0 : i32
    %c0_i32_0 = arith.constant 0 : i32
    %c0_i32_1 = arith.constant 0 : i32
    return %c0_i32, %c0_i32_0 : i32, i32
  }
  func.func @transform_1(%arg0: i32, %arg1: i32) -> (i32, i32) {
    %c0_i32 = arith.constant 0 : i32
    %c0_i32_0 = arith.constant 0 : i32
    %c0_i32_1 = arith.constant 0 : i32
    return %c0_i32, %c0_i32_0 : i32, i32
  }
  func.func @transform_2(%arg0: i32, %arg1: i32) -> (i32, i32, i32) {
    %c0_i32 = arith.constant 0 : i32
    %c0_i32_0 = arith.constant 0 : i32
    return %arg0, %c0_i32, %arg1 : i32, i32, i32
  }
  func.func @transform_3(%arg0: i32, %arg1: i32) -> (i32, i32, i32) {
    %c0_i32 = arith.constant 0 : i32
    %c0_i32_0 = arith.constant 0 : i32
    return %arg0, %c0_i32, %arg1 : i32, i32, i32
  }
}

</mosaic_0001>

<bundles_post_ra>
// kernel: tpu_custom_call.1
= control target key start
LH: loop header
LB: loop body
LE: loop exit
PB: predicated region body
PF: predicated region fallthrough
CT: control target
= control target key end

     0   :  { %8 = vsyncpa [#allocation3], 0  ;;  %s668_s0 = inlined_call_operand.vmem [shape: f32[8,4], index: 0, kind: input, shape index: {}]   ;;  %s669_s1 = inlined_call_operand.vmem [shape: f32[8,1], index: 1, kind: input, shape index: {}]   ;;  %s670_s2 = inlined_call_operand.vmem [shape: f32[2,4,256], index: 2, kind: input, shape index: {}]   ;;  %s671_s3 = inlined_call_operand.hbm [shape: f32[2,8,256], index: 3, kind: output, shape index: {}]  }
   0x1   :  { %10 = vsyncpa [#allocation3 + $0x1], 0  ;;  %s563_s12 = smov 0   ;;  %s565_s13 = smov 0  }
   0x2   :  { %s567_s14 = smov 0   ;;  %s569_s15 = smov 0  }
   0x3   :  { %s571_s16 = smov 0   ;;  %s573_s17 = smov 0  }
   0x4 LB: > { %s385_s18 = sadd.s32 4294967295, %s538_s17   ;;  %s386_s19 = sadd.s32 4294967294, %s538_s17   ;;  %s538_s17 = sphi %s573_s17, %s16_s17   ;;  %s534_s16 = sphi %s571_s16, %s678_s16   ;;  %s530_s15 = sphi %s569_s15, %s677_s15   ;;  %s526_s14 = sphi %s567_s14, %s676_s14   ;;  %s522_s13 = sphi %s565_s13, %s675_s13   ;;  %s518_s12 = sphi %s563_s12, %s674_s12  }
   0x5   : > { %s28_s20 = sadd.s32 1, %s534_s16  ;;  %s107_s21 = sadd.s32 1, %s526_s14 }
   0x6   : > { %p30_p0 = scmp.ge.s32.totalorder %s28_s20, 2  ;;  %p117_p1 = scmp.ne.s32.totalorder %s526_s14, %s522_s13 }
   0x7   : > { %p118_p2 = scmp.eq.s32.totalorder %s385_s18, 1  ;;  %p123_p3 = scmp.ne.s32.totalorder %s522_s13, %s518_s12 }
   0x8   : > { %s680_s20 = smov (%p30_p0, %s28_s20), 0  ;;  %p124_p5 = scmp.eq.s32.totalorder %s386_s19, 1 }
   0x9   : > { %p603_p4 = por %p118_p2, %p117_p1  ;;  %s102_s23 = ssub.s32 %s534_s16, %s680_s20 }
   0xa   : > { %p389_p6 = scmp.ge.s32.totalorder %s538_s17, 1  ;;  %p105_p7 = scmp.eq.s32.totalorder %s102_s23, 0 }
   0xb   : > { %p610_p8 = por %p124_p5, %p123_p3  ;;  %p161_p9 = scmp.lt.s32.totalorder %s538_s17, 3 }
   0xc   : > { %s616_s25 = scalar_select %p105_p7, %s526_s14, %s107_s21  }
   0xd   : > { %p162_p10 = pnand %p389_p6, %p161_p9 }
   0xe   : > { %p190_p11 = scmp.lt.s32.totalorder (!%p162_p10), %s530_s15, 1  ;;  %s186_s8 = sand.u32 (!%p162_p10), 1, %s522_s13  }
   0xf   : > { %165 = sbr.rel (%p162_p10) target bundleno = 239 (0xef), region = 32  ;;  %s390_s9 = sshll.u32 (!%p162_p10), %s186_s8, 4 }
  0x10   : > { %s402_s10 = sshll.u32 (!%p162_p10), %s530_s15, 8  ;;  %s188_s11 = scalar_lea.vmem (!%p162_p10), [#allocation2], %s390_s9 }
  0x11   : > { %s309_s18 = sshll.u32 (!%p162_p10), %s188_s11, 4  ;;  %s307_s23 = scalar_lea.hbm (!%p162_p10), %s671_s3, %s402_s10  ;;  %s310_s18 = int_to_ptr.vmem [resolvable:$true] %s309_s18 }
  0x12   : > { %s293_s26 = scalar_lea.sflag (!%p162_p10), [#allocation3], %s186_s8  ;;  %s462_s27 = scalar_lea.vmem (!%p162_p10), %s310_s18, 256 }
  0x13   : > { %p463_p12 = scmp.ne.s32.totalorder (!%p162_p10), %s310_s18, %s462_s27 }
  0x14   : > { %v540_v0 = vmov 0.0   ;;  %v541_v1 = vmov 0   ;;  %v201_v2 = vld [vmem:[%s669_s1] sm:$0xff]  ;;  %s191_s28 = scalar_select %p190_p11, %s530_s15, 1  ;;  %vm214_vm0 = vcmask 1043456   ;;  %vm210_vm1 = vcmask 31744  }
  0x15   : > { %283 = vmatprep.mubr.f32.mxu0 %v540_v0  ;;  %460 = vset.pattern.permute.xlu0 %v541_v1  ;;  %v200_v5 = vld [vmem:[%s668_s0] sm:$0xff]  ;;  %p464_p13 = pnand %p463_p12, %p603_p4 }
  0x16   : > { %205 = vperm.xlu0 %460, %v201_v2   ;;  %s401_s29 = sshll.u32 %s191_s28, 3  ;;  %s542_s28 = smov [#allocation2]  }
  0x17   : > { %s197_s5 = scalar_lea.vmem %s670_s2, %s401_s29  ;;  %p465_p0 = pneg %p464_p13 }
  0x18   : > { %v202_v3 = vld [vmem:[%s197_s5] sm:$0xff]  ;;  %s466_s15 = sshll.u32 %s542_s28, 4  ;;  %s467_s15 = int_to_ptr.vmem [resolvable:$false] %s466_s15 }
  0x19   : > { %v209_v4 = vcombine.high %v202_v3, %v202_v3  ;;  %s468_s29 = scalar_lea.vmem %s467_s15, 512  ;;  %p469_p1 = scmp.lt.s32.totalorder %s310_s18, %s467_s15 }
  0x1a   : > { %p470_p2 = scmp.lt.s32.totalorder %s468_s29, %s462_s27 }
  0x1b   : > { %393 = vmatprep.subr.msk.mxu0 %vm214_vm0, %v209_v4 }
  0x1c   : > { %394 = vmatpush1.msk.msra.mxu0 %vm214_vm0, %v202_v3  ;;  %p471_p3 = por %p470_p2, %p469_p1 }
  0x1d   : > { %395 = vmatmul.mubr.msk.f32.vlgmr.msra.gmra.mxu0 %vm210_vm1, %v200_v5 }
  0x1e   : > { %p472_p5 = pnand %p471_p3, %p465_p0 }
  0x91   : > { %v206_v6 = vpop.permute.xlu0 %205 }
  0xdd   : > { %v285_v7 = vpop.f32.mrf.mxu0 }
  0xde   : > { %v286_v8 = vadd.f32 %v285_v7, %v206_v6 }
  0xdf   : > { %v287_v9 = vpop.f32.mrf.mxu0 }
  0xe0   : > { %290 = vst [vmem:[%s188_s11] sm:$0xff] %v286_v8  ;;  %v288_v10 = vadd.f32 %v287_v9, %v206_v6 }
  0xe2   : > { %291 = vst [vmem:[%s188_s11 + $0x8] sm:$0xff] %v288_v10 }
  0xe3   : > { %475 = shalt.err (!%p472_p5)
}
  0xe4   : > { %s476_s30 = scalar_lea.hbm %s307_s23, 256  ;;  %s480_s6 = scalar_lea.hbm %s671_s3, 512 }
  0xe5   : > { %p477_p6 = scmp.ne.s32.totalorder %s307_s23, %s476_s30  ;;  %p481_p10 = scmp.lt.s32.totalorder %s307_s23, %s671_s3 }
  0xe6   : > { %p482_p11 = scmp.lt.s32.totalorder %s480_s6, %s476_s30 }
  0xe7   : > { %p478_p7 = pnand %p477_p6, %p603_p4 }
  0xe8   : > { %p483_p12 = por %p482_p11, %p481_p10 }
  0xe9   : > { %p479_p9 = pneg %p478_p7 }
  0xeb   : > { %p484_p13 = pnand %p483_p12, %p479_p9 }
  0xed   : > { %487 = shalt.err (!%p484_p13)
}
  0xee   : > { %403 = dma.vmem_to_hbm [thread:$0]  (%p603_p4), %s310_s18, 256, %s307_s23, %s293_s26  }
  0xef PF: > { %p409_p0 = scmp.ge.s32.totalorder %s538_s17, 2  ;;  %s321_s9 = sand.u32 1, %s518_s12  }
  0xf0   : > { %s322_s10 = scalar_lea.sflag [#allocation3], %s321_s9 }
  0xf1   : > { %p406_p1 = pnand %p409_p0, %p610_p8 }
  0xf3   : > { %p407_p2 = pneg %p406_p1 }
  0xf5   : > { %513 = dma.done.wait (%p407_p2), %s322_s10, 256  }
  0xf6   : > { %515 = vsyncadd (%p407_p2), %s322_s10, 4294967040  ;;  %s16_s17 = sadd.s32 1, %s538_s17   ;;  %s674_s12 = smov %s522_s13 }
  0xf7   : > { %p13_p3 = scmp.ge.s32.totalorder %s16_s17, 4   ;;  %s675_s13 = smov %s526_s14 }
  0xf8   : > { %s676_s14 = smov %s616_s25  ;;  %s677_s15 = smov %s534_s16 }
  0xf9   : > { %s678_s16 = smov %s680_s20  ;;  %15 = sbr.rel (!%p13_p3) target bundleno = 4 (0x4), region = 67 }
  0xfe   :  { %327 = vsyncpa [#allocation3], 1 }
  0xff   :  { %329 = vsyncpa [#allocation3 + $0x1], 1 }

</bundles_post_ra>
